<compile_context>
chip_gen: v7x
topology: tpu7x:2x2x1
jax: 0.10.0
libtpu: 0.0.40
codegen_flags: <defaults>
</compile_context>

<pallas_src>
import functools

import jax
import jax.numpy as jnp
import numpy as np
from jax.experimental import pallas as pl
from jax.experimental.pallas import tpu as pltpu

_LANES = 128
_MAX_TILE_ROWS = 2048        # (2048,128) f32 tile = 1 MiB/input; x2 inputs x2 bufs = 4 MiB VMEM
_ROW_MULT = 32               # covers f32(8)/bf16(16)/int8,fp8(32) sublane packing
_MIN_PALLAS_ELEMS = 4096     # below this (or ragged n % 128 != 0) use the pure-JAX path


def _round_up(x, m):
    return ((x + m - 1) // m) * m


def _wbce_kernel(pred_ref, gt_ref, out_ref, *, pos_weight, tile_rows, rows_rem):
    """One (tile_rows, 128) tile of the streaming weighted-BCE reduction."""
    i = pl.program_id(0)

    @pl.when(i == 0)
    def _():
        out_ref[...] = jnp.zeros_like(out_ref)

    # DMA'd in native dtype; upcast to f32 in-register (all math f32 -> v5e safe).
    x = pred_ref[...].astype(jnp.float32)            # (tile_rows, 128)
    y = gt_ref[...].astype(jnp.float32)

    # BCEWithLogitsLoss(pos_weight=pw), numerically stable:
    #   l = (1 - y)*x + (1 + (pw - 1)*y) * softplus(-x)
    #   softplus(-x) = max(-x, 0) + log1p(exp(-|x|))
    sp_negx = jnp.maximum(-x, 0.0) + jnp.log1p(jnp.exp(-jnp.abs(x)))
    per = (1.0 - y) * x + (1.0 + (pos_weight - 1.0) * y) * sp_negx

    def accumulate(vals):
        # fold the tile down to one (8, 128) partial-sum vreg (pure VPU adds)
        out_ref[...] += jnp.sum(vals.reshape(tile_rows // 8, 8, _LANES), axis=0)

    if rows_rem:  # static: grid does not evenly divide rows -> mask only the boundary tile
        last = pl.num_programs(0) - 1

        @pl.when(i != last)
        def _():
            accumulate(per)

        @pl.when(i == last)
        def _():
            row = jax.lax.broadcasted_iota(jnp.int32, (tile_rows, _LANES), 0)
            accumulate(jnp.where(row < rows_rem, per, 0.0))
    else:
        accumulate(per)


def _reference_loss(pred, gt, beta=0.05):
    """Pure-JAX transcription of BCEWithLogitsLoss(pos_weight=1/beta), mean reduction."""
    pw = 1.0 / float(beta)
    x = pred.reshape(-1).astype(jnp.float32)
    y = gt.reshape(-1).astype(jnp.float32)
    sp = jnp.maximum(-x, 0.0) + jnp.log1p(jnp.exp(-jnp.abs(x)))
    per = (1.0 - y) * x + (1.0 + (pw - 1.0) * y) * sp
    return jnp.mean(per)


def weighted_bce_loss(pred, gt, beta=0.05, logit=True):
    """Pallas implementation of WeightedBCELoss.forward (logit=True branch)."""
    # TODO(synk): logit=False branch (plain BCELoss on probabilities) not implemented.
    assert logit, "only the logit=True branch (BCEWithLogitsLoss) is implemented"
    pos_weight = 1.0 / float(beta)

    n = int(np.prod(pred.shape))
    assert int(np.prod(gt.shape)) == n, "pred and gt must have the same number of elements"

    # Tiny or ragged (n not a multiple of 128) inputs: kernel-launch / tail handling
    # cost dominates -> pure-JAX path (identical math).
    if n % _LANES != 0 or n < _MIN_PALLAS_ELEMS:
        return _reference_loss(pred, gt, beta=beta)

    rows = n // _LANES
    tile_rows = min(_MAX_TILE_ROWS, _round_up(rows, _ROW_MULT))
    num_tiles = pl.cdiv(rows, tile_rows)
    rows_rem = rows % tile_rows      # valid rows in the (possibly partial) last tile

    # .view(-1) + lane-dense (rows, 128) layout: a pure reshape, no pad, no copy.
    p2 = pred.reshape(rows, _LANES)
    g2 = gt.reshape(rows, _LANES)

    kernel = functools.partial(
        _wbce_kernel,
        pos_weight=pos_weight,
        tile_rows=tile_rows,
        rows_rem=rows_rem,
    )

    partial_sums = pl.pallas_call(
        kernel,
        out_shape=jax.ShapeDtypeStruct((8, _LANES), jnp.float32),
        grid_spec=pltpu.PrefetchScalarGridSpec(
            num_scalar_prefetch=0,
            grid=(num_tiles,),
            in_specs=[
                pl.BlockSpec((tile_rows, _LANES), lambda i: (i, 0)),
                pl.BlockSpec((tile_rows, _LANES), lambda i: (i, 0)),
            ],
            # Constant output block index across the reduction axis -> the (8,128)
            # accumulator stays VMEM-resident; written back once at the end.
            out_specs=pl.BlockSpec((8, _LANES), lambda i: (0, 0)),
        ),
        compiler_params=pltpu.CompilerParams(
            dimension_semantics=("arbitrary",),
            vmem_limit_bytes=32 * 1024 * 1024,
        ),
    )(p2, g2)

    # tiny JAX epilogue: combine the (8,128) partial sums, mean over N
    return jnp.sum(partial_sums) / float(n)


if __name__ == "__main__":
    beta = 0.05
    key = jax.random.PRNGKey(0)
    k1, k2, k3, k4, k5, k6 = jax.random.split(key, 6)

    # 1) Pallas path, evenly tiled: (2,1,64,64) -> 8192 elems -> 64 rows of 128.
    shape = (2, 1, 64, 64)
    pred = jax.random.normal(k1, shape, dtype=jnp.float32)
    gt = jax.random.bernoulli(k2, p=beta, shape=shape).astype(jnp.float32)
    loss = jax.block_until_ready(weighted_bce_loss(pred, gt, beta=beta, logit=True))
    ref = jax.block_until_ready(_reference_loss(pred, gt, beta=beta))
    np.testing.assert_allclose(np.asarray(loss), np.asarray(ref), rtol=1e-5, atol=1e-6)

    # 2) Pallas path, partial last tile (rows=120 < tile_rows=128) + bf16 inputs.
    shape = (2, 1, 80, 96)   # 15360 elems -> 120 rows
    pred = jax.random.normal(k3, shape, dtype=jnp.float32).astype(jnp.bfloat16)
    gt = jax.random.bernoulli(k4, p=beta, shape=shape).astype(jnp.bfloat16)
    loss = jax.block_until_ready(weighted_bce_loss(pred, gt, beta=beta, logit=True))
    ref = jax.block_until_ready(_reference_loss(pred, gt, beta=beta))
    np.testing.assert_allclose(np.asarray(loss), np.asarray(ref), rtol=1e-5, atol=1e-6)

    # 3) Small-shape fallback path (module-typical small input): (2,1,16,16).
    shape = (2, 1, 16, 16)
    pred = jax.random.normal(k5, shape, dtype=jnp.float32)
    gt = jax.random.bernoulli(k6, p=beta, shape=shape).astype(jnp.float32)
    loss = jax.block_until_ready(weighted_bce_loss(pred, gt, beta=beta, logit=True))
    ref = jax.block_until_ready(_reference_loss(pred, gt, beta=beta))
    np.testing.assert_allclose(np.asarray(loss), np.asarray(ref), rtol=1e-5, atol=1e-6)

    print("KERNEL_OK")
</pallas_src>

<mosaic_0001>
module attributes {stable_mosaic.version = 11 : i64} {
  func.func @_wbce_kernel(%arg0: i32, %arg1: memref<64x128xf32, #tpu.memory_space<vmem>>, %arg2: memref<64x128xf32, #tpu.memory_space<vmem>>, %arg3: memref<8x128xf32, #tpu.memory_space<vmem>>) attributes {dimension_semantics = [#tpu.dimension_semantics<arbitrary>], iteration_bounds = array<i64: 1>, scalar_prefetch = 0 : i64, scratch_operands = 0 : i64, tpu.core_type = #tpu.core_type<tc>, window_params = [{transform_indices = @transform_0, window_bounds = array<i64: 64, 128>}, {transform_indices = @transform_1, window_bounds = array<i64: 64, 128>}, {pipeline_mode = #tpu.pipeline_mode<synchronous>, transform_indices = @transform_2, window_bounds = array<i64: 8, 128>}]} {
    %c0_i32 = arith.constant 0 : i32
    %0 = arith.cmpi eq, %arg0, %c0_i32 : i32
    %1 = arith.extui %0 : i1 to i32
    %c0_i32_0 = arith.constant 0 : i32
    %2 = arith.cmpi ne, %1, %c0_i32_0 : i32
    scf.if %2 {
      %cst_14 = arith.constant 0.000000e+00 : f32
      %29 = vector.broadcast %cst_14 : f32 to vector<8x128xf32>
      %c0_15 = arith.constant 0 : index
      %c0_16 = arith.constant 0 : index
      %30 = vector.load %arg3[%c0_15, %c0_16] : memref<8x128xf32, #tpu.memory_space<vmem>>, vector<8x128xf32>
      tpu.vector_store %arg3[%c0_15, %c0_16], %29 {strides = array<i32>} : memref<8x128xf32, #tpu.memory_space<vmem>>, vector<8x128xf32>,
    } else {
    }
    %c0 = arith.constant 0 : index
    %c0_1 = arith.constant 0 : index
    %3 = vector.load %arg1[%c0, %c0_1] : memref<64x128xf32, #tpu.memory_space<vmem>>, vector<64x128xf32>
    %c0_2 = arith.constant 0 : index
    %c0_3 = arith.constant 0 : index
    %4 = vector.load %arg2[%c0_2, %c0_3] : memref<64x128xf32, #tpu.memory_space<vmem>>, vector<64x128xf32>
    %cst = arith.constant 0.000000e+00 : f32
    %5 = vector.broadcast %cst : f32 to vector<64x128xf32>
    %6 = arith.subf %5, %3 : vector<64x128xf32>
    %cst_4 = arith.constant 0.000000e+00 : f32
    %7 = vector.broadcast %cst_4 : f32 to vector<64x128xf32>
    %8 = arith.maximumf %6, %7 : vector<64x128xf32>
    %9 = math.absf %3 : vector<64x128xf32>
    %cst_5 = arith.constant 0.000000e+00 : f32
    %10 = vector.broadcast %cst_5 : f32 to vector<64x128xf32>
    %11 = arith.subf %10, %9 : vector<64x128xf32>
    %12 = math.exp %11 : vector<64x128xf32>
    %13 = math.log1p %12 : vector<64x128xf32>
    %14 = arith.addf %8, %13 : vector<64x128xf32>
    %cst_6 = arith.constant 1.000000e+00 : f32
    %15 = vector.broadcast %cst_6 : f32 to vector<64x128xf32>
    %16 = arith.subf %15, %4 : vector<64x128xf32>
    %17 = arith.mulf %16, %3 : vector<64x128xf32>
    %cst_7 = arith.constant 1.900000e+01 : f32
    %18 = vector.broadcast %cst_7 : f32 to vector<64x128xf32>
    %19 = arith.mulf %18, %4 : vector<64x128xf32>
    %cst_8 = arith.constant 1.000000e+00 : f32
    %20 = vector.broadcast %cst_8 : f32 to vector<64x128xf32>
    %21 = arith.addf %20, %19 : vector<64x128xf32>
    %22 = arith.mulf %21, %14 : vector<64x128xf32>
    %23 = arith.addf %17, %22 : vector<64x128xf32>
    %c0_9 = arith.constant 0 : index
    %c0_10 = arith.constant 0 : index
    %24 = vector.load %arg3[%c0_9, %c0_10] : memref<8x128xf32, #tpu.memory_space<vmem>>, vector<8x128xf32>
    %25 = vector.shape_cast %23 : vector<64x128xf32> to vector<8x8x128xf32>
    %cst_11 = arith.constant dense<0.000000e+00> : vector<8x128xf32>
    %26 = vector.multi_reduction <add>, %25, %cst_11 [0] : vector<8x8x128xf32> to vector<8x128xf32>
    %27 = arith.addf %24, %26 : vector<8x128xf32>
    %c0_12 = arith.constant 0 : index
    %c0_13 = arith.constant 0 : index
    %28 = vector.load %arg3[%c0_12, %c0_13] : memref<8x128xf32, #tpu.memory_space<vmem>>, vector<8x128xf32>
    tpu.vector_store %arg3[%c0_12, %c0_13], %27 {strides = array<i32>} : memref<8x128xf32, #tpu.memory_space<vmem>>, vector<8x128xf32>,
    return
  }
  func.func @transform_0(%arg0: i32) -> (i32, i32) {
    %c0_i32 = arith.constant 0 : i32
    %c0_i32_0 = arith.constant 0 : i32
    return %arg0, %c0_i32 : i32, i32
  }
  func.func @transform_1(%arg0: i32) -> (i32, i32) {
    %c0_i32 = arith.constant 0 : i32
    %c0_i32_0 = arith.constant 0 : i32
    return %arg0, %c0_i32 : i32, i32
  }
  func.func @transform_2(%arg0: i32) -> (i32, i32) {
    %c0_i32 = arith.constant 0 : i32
    %c0_i32_0 = arith.constant 0 : i32
    %c0_i32_1 = arith.constant 0 : i32
    return %c0_i32, %c0_i32_0 : i32, i32
  }
}

</mosaic_0001>

<bundles_post_ra>
// kernel: tpu_custom_call.1
= control target key start
LH: loop header
LB: loop body
LE: loop exit
PB: predicated region body
PF: predicated region fallthrough
CT: control target
= control target key end

     0   :  { %7 = vsyncpa [#allocation3], 0  ;;  %s598_s0 = inlined_call_operand.hbm [shape: f32[64,128], index: 0, kind: input, shape index: {}]   ;;  %s599_s1 = inlined_call_operand.hbm [shape: f32[64,128], index: 1, kind: input, shape index: {}]   ;;  %s600_s2 = inlined_call_operand.hbm [shape: f32[8,128], index: 2, kind: output, shape index: {}]  }
   0x1   :  { %8 = vsyncpa [#allocation6], 0 }
   0x2   :  { %9 = vsyncpa [#allocation4], 0  ;;  %s373_s9 = smov [#allocation2]   ;;  %s301_s13 = scalar_lea.hbm %s598_s0, 1024 }
   0x3   :  { %s15_s10 = sshll.u32 %s373_s9, 4  ;;  %p302_p0 = scmp.ne.s32.totalorder %s598_s0, %s301_s13  ;;  %s16_s10 = int_to_ptr.vmem [resolvable:$true] %s15_s10 }
   0x4   :  { %p305_p1 = scmp.lt.u32.totalorder %s301_s13, %s598_s0 }
   0x6   :  { %p307_p2 = pnand %p305_p1, %p302_p0 }
   0x8   :  { %310 = shalt.err (!%p307_p2)
}
   0x9   :  { %s311_s18 = scalar_lea.vmem %s16_s10, 1024  ;;  %p316_p4 = scmp.lt.s32.totalorder %s16_s10, %s16_s10 }
   0xa   :  { %p312_p3 = scmp.ne.s32.totalorder %s16_s10, %s311_s18  ;;  %p317_p5 = scmp.lt.s32.totalorder %s311_s18, %s311_s18 }
   0xc   :  { %p318_p6 = por %p317_p5, %p316_p4 }
   0xe   :  { %p319_p7 = pnand %p318_p6, %p312_p3 }
  0x10   :  { %322 = shalt.err (!%p319_p7)
}
  0x11   :  { %s374_s19 = smov 128   ;;  %s375_s20 = smov 8  }
  0x12   :  { %21 = dma.hbm_to_vmem [thread:$0]  %s598_s0, 1024, %s16_s10, [#allocation3], %s374_s19, %s374_s19, %s375_s20  }
  0x13   :  { %s376_s23 = smov [#allocation5]   ;;  %s323_s27 = scalar_lea.hbm %s599_s1, 1024 }
  0x14   :  { %s27_s24 = sshll.u32 %s376_s23, 4  ;;  %p324_p8 = scmp.ne.s32.totalorder %s599_s1, %s323_s27  ;;  %s28_s24 = int_to_ptr.vmem [resolvable:$true] %s27_s24 }
  0x15   :  { %p327_p9 = scmp.lt.u32.totalorder %s323_s27, %s599_s1 }
  0x17   :  { %p329_p10 = pnand %p327_p9, %p324_p8 }
  0x19   :  { %332 = shalt.err (!%p329_p10)
}
  0x1a   :  { %s333_s4 = scalar_lea.vmem %s28_s24, 1024  ;;  %p338_p12 = scmp.lt.s32.totalorder %s28_s24, %s28_s24 }
  0x1b   :  { %p334_p11 = scmp.ne.s32.totalorder %s28_s24, %s333_s4  ;;  %p339_p13 = scmp.lt.s32.totalorder %s333_s4, %s333_s4 }
  0x1d   :  { %p340_p0 = por %p339_p13, %p338_p12 }
  0x1f   :  { %p341_p1 = pnand %p340_p0, %p334_p11 }
  0x21   :  { %344 = shalt.err (!%p341_p1)
}
  0x22   :  { %33 = dma.hbm_to_vmem [thread:$0]  %s599_s1, 1024, %s28_s24, [#allocation6], %s374_s19, %s374_s19, %s375_s20  }
  0x23   :  { %367 = dma.done.wait [#allocation3], 1024  }
  0x24   :  { %368 = vsyncadd [#allocation3], 4294966272 }
  0x25   :  { %369 = dma.done.wait [#allocation6], 1024  }
  0x26   :  { %370 = vsyncadd [#allocation6], 4294966272  ;;  %v417_v0 = vld [vmem:[#allocation2] sm:$0xff]  ;;  %v419_v1 = vld [vmem:[#allocation2 + $0x8] sm:$0xff]  ;;  %s377_s1 = smov [#allocation7]  }
  0x27   :  { %v421_v2 = vld [vmem:[#allocation2 + $0x10] sm:$0xff]  ;;  %v423_v3 = vld [vmem:[#allocation2 + $0x18] sm:$0xff]  ;;  %v425_v4 = vld [vmem:[#allocation2 + $0x20] sm:$0xff]  ;;  %v77_v8 = vand.u32 2147483647, %v417_v0  ;;  %v61_v24 = vsub.f32 0.0, %v417_v0 }
  0x28   :  { %v427_v5 = vld [vmem:[#allocation2 + $0x28] sm:$0xff]  ;;  %v429_v6 = vld [vmem:[#allocation2 + $0x30] sm:$0xff]  ;;  %v431_v7 = vld [vmem:[#allocation2 + $0x38] sm:$0xff]  ;;  %v78_v9 = vand.u32 2147483647, %v419_v1  ;;  %v62_v28 = vsub.f32 0.0, %v419_v1 }
  0x29   :  { %v79_v10 = vand.u32 2147483647, %v421_v2  ;;  %v80_v11 = vand.u32 2147483647, %v423_v3  ;;  %v81_v12 = vand.u32 2147483647, %v425_v4 }
  0x2a   :  { %v82_v13 = vand.u32 2147483647, %v427_v5  ;;  %v83_v14 = vand.u32 2147483647, %v429_v6  ;;  %v85_v15 = vsub.f32 0.0, %v77_v8  ;;  %v86_v16 = vsub.f32 0.0, %v78_v9 }
  0x2b   :  { %v84_v17 = vand.u32 2147483647, %v431_v7  ;;  %v87_v18 = vsub.f32 0.0, %v79_v10  ;;  %v88_v19 = vsub.f32 0.0, %v80_v11  ;;  %v89_v20 = vsub.f32 0.0, %v81_v12  ;;  %v53_v34 = vld [vmem:[#allocation5] sm:$0xff] }
  0x2c   :  { %v90_v21 = vsub.f32 0.0, %v82_v13  ;;  %v93_v22 = vmul.f32 1.442695, %v85_v15  ;;  %v95_v23 = vmul.f32 1.442695, %v86_v16  ;;  %v91_v25 = vsub.f32 0.0, %v83_v14 }
  0x2d   :  { %v97_v26 = vmul.f32 1.442695, %v87_v18  ;;  %v99_v27 = vmul.f32 1.442695, %v88_v19  ;;  %v63_v29 = vsub.f32 0.0, %v421_v2  ;;  %v64_v31 = vsub.f32 0.0, %v423_v3 }
  0x2e   :  { %269 = vpow2.f32 %v93_v22  ;;  %v101_v30 = vmul.f32 1.442695, %v89_v20  ;;  %v65_v32 = vsub.f32 0.0, %v425_v4  ;;  %v92_v33 = vsub.f32 0.0, %v84_v17  ;;  %v54_v38 = vld [vmem:[#allocation5 + $0x8] sm:$0xff]  ;;  %v55_v39 = vld [vmem:[#allocation5 + $0x10] sm:$0xff] }
  0x2f   :  { %271 = vpow2.f32 %v95_v23  ;;  %v66_v35 = vsub.f32 0.0, %v427_v5  ;;  %v67_v36 = vsub.f32 0.0, %v429_v6  ;;  %v103_v37 = vmul.f32 1.442695, %v90_v21  ;;  %v56_v43 = vld [vmem:[#allocation5 + $0x18] sm:$0xff]  ;;  %v57_v44 = vld [vmem:[#allocation5 + $0x20] sm:$0xff] }
  0x30   :  { %273 = vpow2.f32 %v97_v26  ;;  %v68_v40 = vsub.f32 0.0, %v431_v7  ;;  %v449_v41 = vmax.f32 %v61_v24, 0.0  ;;  %v105_v42 = vmul.f32 1.442695, %v91_v25  ;;  %v58_v45 = vld [vmem:[#allocation5 + $0x28] sm:$0xff]  ;;  %v59_v49 = vld [vmem:[#allocation5 + $0x30] sm:$0xff] }
  0x31   :  { %275 = vpow2.f32 %v99_v27  ;;  %v451_v46 = vmax.f32 %v62_v28, 0.0  ;;  %v453_v47 = vmax.f32 %v63_v29, 0.0  ;;  %v189_v48 = vsub.f32 1.0, %v53_v34  ;;  %v455_v57 = vld [vmem:[#allocation5 + $0x38] sm:$0xff]  ;;  %s253_s6 = sshll.u32 %s377_s1, 4  ;;  %s254_s6 = int_to_ptr.vmem [resolvable:$true] %s253_s6 }
  0x32   :  { %277 = vpow2.f32 %v101_v30  ;;  %v107_v50 = vmul.f32 1.442695, %v92_v33  ;;  %v190_v51 = vsub.f32 1.0, %v54_v38  ;;  %v191_v52 = vsub.f32 1.0, %v55_v39  ;;  %s345_s7 = scalar_lea.vmem %s254_s6, 128  ;;  %p350_p3 = scmp.lt.s32.totalorder %s254_s6, %s254_s6 }
  0x33   :  { %v192_v53 = vsub.f32 1.0, %v56_v43  ;;  %279 = vpow2.f32 %v103_v37  ;;  %v193_v54 = vsub.f32 1.0, %v57_v44  ;;  %v194_v55 = vsub.f32 1.0, %v58_v45  ;;  %p346_p2 = scmp.ne.s32.totalorder %s254_s6, %s345_s7  ;;  %p351_p4 = scmp.lt.s32.totalorder %s345_s7, %s345_s7 }
  0x34   :  { %v195_v56 = vsub.f32 1.0, %v59_v49  ;;  %v457_v58 = vmax.f32 %v64_v31, 0.0  ;;  %v459_v59 = vmax.f32 %v65_v32, 0.0  ;;  %v461_v60 = vmax.f32 %v66_v35, 0.0 }
  0x35   :  { %281 = vpow2.f32 %v105_v42  ;;  %v463_v61 = vmax.f32 %v67_v36, 0.0  ;;  %v465_v62 = vmax.f32 %v68_v40, 0.0  ;;  %v196_v63 = vsub.f32 1.0, %v455_v57  ;;  %p352_p5 = por %p351_p4, %p350_p3 }
  0x36   :  { %v469_v8 = vmul.f32 %v189_v48, %v417_v0  ;;  %283 = vpow2.f32 %v107_v50  ;;  %v472_v9 = vmul.f32 %v190_v51, %v419_v1  ;;  %v475_v10 = vmul.f32 %v191_v52, %v421_v2 }
  0x37   :  { %v478_v11 = vmul.f32 %v192_v53, %v423_v3  ;;  %v481_v13 = vmul.f32 %v193_v54, %v425_v4  ;;  %v484_v14 = vmul.f32 %v194_v55, %v427_v5  ;;  %v487_v0 = vmul.f32 %v195_v56, %v429_v6  ;;  %p353_p6 = pnand %p352_p5, %p346_p2 }
  0x38   :  { %v270_v12 = vpop.eup %269  ;;  %v205_v15 = vmul.f32 19.0, %v53_v34  ;;  %v206_v17 = vmul.f32 19.0, %v54_v38  ;;  %v207_v18 = vmul.f32 19.0, %v55_v39  ;;  %v208_v2 = vmul.f32 19.0, %v56_v43 }
  0x39   :  { %v272_v16 = vpop.eup %271  ;;  %v109_v1 = vadd.f32 1.0, %v270_v12  ;;  %v112_v20 = vmul.f32 -0.5, %v270_v12  ;;  %v209_v21 = vmul.f32 19.0, %v57_v44  ;;  %v210_v22 = vmul.f32 19.0, %v58_v45 }
  0x3a   :  { %v274_v19 = vpop.eup %273  ;;  %v118_v3 = vadd.f32 1.0, %v272_v16  ;;  %v489_v24 = vmul.f32 19.0, %v59_v49  ;;  %v492_v5 = vmul.f32 19.0, %v455_v57  ;;  %v115_v25 = vand.u32 2147483647, %v270_v12 }
  0x3b   :  { %v276_v23 = vpop.eup %275  ;;  %285 = vlog2.f32 %v109_v1  ;;  %v127_v4 = vadd.f32 1.0, %v274_v19  ;;  %v121_v26 = vmul.f32 -0.5, %v272_v16  ;;  %v494_v27 = vadd.f32 1.0, %v205_v15 }
  0x3c   :  { %v278_v6 = vpop.eup %277  ;;  %287 = vlog2.f32 %v118_v3  ;;  %v130_v28 = vmul.f32 -0.5, %v274_v19  ;;  %v136_v29 = vadd.f32 1.0, %v276_v23  ;;  %v496_v30 = vadd.f32 1.0, %v206_v17 }
  0x3d   :  { %289 = vlog2.f32 %v127_v4  ;;  %v280_v31 = vpop.eup %279  ;;  %v113_v32 = vadd.f32 1.0, %v112_v20  ;;  %v124_v33 = vand.u32 2147483647, %v272_v16  ;;  %v498_v34 = vadd.f32 1.0, %v207_v18 }
  0x3e   :  { %v500_v35 = vadd.f32 1.0, %v208_v2  ;;  %291 = vlog2.f32 %v136_v29  ;;  %v139_v37 = vmul.f32 -0.5, %v276_v23  ;;  %v145_v38 = vadd.f32 1.0, %v278_v6 }
  0x3f   :  { %v502_v36 = vpop.eup %281  ;;  %v504_v39 = vadd.f32 1.0, %v209_v21  ;;  %vm506_vm0 = vcmp.lt.f32.partialorder %v115_v25, 0.0004427343  ;;  %v122_v42 = vadd.f32 1.0, %v121_v26  ;;  %v148_v43 = vmul.f32 -0.5, %v278_v6 }
  0x40   :  { %v510_v44 = vadd.f32 1.0, %v210_v22  ;;  %v512_v45 = vpop.eup %283  ;;  %v131_v48 = vadd.f32 1.0, %v130_v28  ;;  %v133_v49 = vand.u32 2147483647, %v274_v19  ;;  %293 = vlog2.f32 %v145_v38 }
  0x41   :  { %v154_v50 = vadd.f32 1.0, %v280_v31  ;;  %v114_v51 = vmul.f32 %v270_v12, %v113_v32  ;;  %vm514_vm1 = vcmp.lt.f32.partialorder %v124_v33, 0.0004427343  ;;  %v142_v53 = vand.u32 2147483647, %v276_v23 }
  0x42   :  { %v163_v54 = vadd.f32 1.0, %v502_v36  ;;  %v140_v55 = vadd.f32 1.0, %v139_v37  ;;  %v151_v56 = vand.u32 2147483647, %v278_v6  ;;  %v157_v15 = vmul.f32 -0.5, %v280_v31 }
  0x43   :  { %295 = vlog2.f32 %v154_v50  ;;  %v123_v1 = vmul.f32 %v272_v16, %v122_v42  ;;  %v149_v17 = vadd.f32 1.0, %v148_v43  ;;  %v172_v18 = vadd.f32 1.0, %v512_v45 }
  0x44   :  { %297 = vlog2.f32 %v163_v54  ;;  %v132_v20 = vmul.f32 %v274_v19, %v131_v48  ;;  %vm520_vm2 = vcmp.lt.f32.partialorder %v133_v49, 0.0004427343  ;;  %v160_v3 = vand.u32 2147483647, %v280_v31 }
  0x45   :  { %v286_v2 = vpop.eup %285  ;;  %v166_v21 = vmul.f32 -0.5, %v502_v36  ;;  %vm525_vm3 = vcmp.lt.f32.partialorder %v142_v53, 0.0004427343  ;;  %299 = vlog2.f32 %v172_v18  ;;  %v175_v16 = vmul.f32 -0.5, %v512_v45 }
  0x46   :  { %v288_v22 = vpop.eup %287  ;;  %v111_v4 = vmul.f32 0.6931472, %v286_v2  ;;  %v141_v29 = vmul.f32 %v276_v23, %v140_v55  ;;  %vm530_vm4 = vcmp.lt.f32.partialorder %v151_v56, 0.0004427343  ;;  %v158_v32 = vadd.f32 1.0, %v157_v15 }
  0x47   :  { %v290_v26 = vpop.eup %289  ;;  %v120_v28 = vmul.f32 0.6931472, %v288_v22  ;;  %v150_v38 = vmul.f32 %v278_v6, %v149_v17  ;;  %v169_v42 = vand.u32 2147483647, %v502_v36  ;;  %vm539_vm5 = vcmp.lt.f32.partialorder %v160_v3, 0.0004427343 }
  0x48   :  { %v117_v33 = vsel %vm506_vm0, %v114_v51, %v111_v4  ;;  %v129_v37 = vmul.f32 0.6931472, %v290_v26  ;;  %v292_v43 = vpop.eup %291  ;;  %v167_v23 = vadd.f32 1.0, %v166_v21  ;;  %v176_v51 = vadd.f32 1.0, %v175_v16 }
  0x49   :  { %v126_v48 = vsel %vm514_vm1, %v123_v1, %v120_v28  ;;  %v181_v50 = vadd.f32 %v117_v33, %v449_v41  ;;  %v138_v40 = vmul.f32 0.6931472, %v292_v43  ;;  %v159_v55 = vmul.f32 %v280_v31, %v158_v32 }
  0x4a   :  { %v135_v53 = vsel %vm520_vm2, %v132_v20, %v129_v37  ;;  %v182_v6 = vadd.f32 %v126_v48, %v451_v46  ;;  %v294_v54 = vpop.eup %293  ;;  %v178_v56 = vand.u32 2147483647, %v512_v45  ;;  %vm552_vm6 = vcmp.lt.f32.partialorder %v169_v42, 0.0004427343 }
  0x4b   :  { %v183_v52 = vadd.f32 %v135_v53, %v453_v47  ;;  %v221_v15 = vmul.f32 %v494_v27, %v181_v50  ;;  %v144_v1 = vsel %vm525_vm3, %v141_v29, %v138_v40  ;;  %v147_v17 = vmul.f32 0.6931472, %v294_v54 }
  0x4c   :  { %v222_v18 = vmul.f32 %v496_v30, %v182_v6  ;;  %v168_v46 = vmul.f32 %v502_v36, %v167_v23  ;;  %v184_v31 = vadd.f32 %v144_v1, %v457_v58  ;;  %v177_v21 = vmul.f32 %v512_v45, %v176_v51 }
  0x4d   :  { %v296_v2 = vpop.eup %295  ;;  %v223_v20 = vmul.f32 %v498_v34, %v183_v52  ;;  %v229_v47 = vadd.f32 %v221_v15, %v469_v8  ;;  %v153_v12 = vsel %vm530_vm4, %v150_v38, %v147_v17  ;;  %vm179_vm7 = vcmp.lt.f32.partialorder %v178_v56, 0.0004427343 }
  0x4e   :  { %v298_v27 = vpop.eup %297  ;;  %v156_v3 = vmul.f32 0.6931472, %v296_v2  ;;  %v230_v22 = vadd.f32 %v222_v18, %v472_v9  ;;  %v185_v30 = vadd.f32 %v153_v12, %v459_v59  ;;  %v224_v36 = vmul.f32 %v500_v35, %v184_v31 }
  0x4f   :  { %v165_v4 = vmul.f32 0.6931472, %v298_v27  ;;  %v231_v58 = vadd.f32 %v223_v20, %v475_v10  ;;  %v300_v25 = vpop.eup %299  ;;  %v219_v34 = vadd.f32 1.0, %v489_v24  ;;  %v220_v10 = vadd.f32 1.0, %v492_v5 }
  0x50   :  { %v162_v8 = vsel %vm539_vm5, %v159_v55, %v156_v3  ;;  %v238_v16 = vadd.f32 %v230_v22, %v229_v47  ;;  %v174_v26 = vmul.f32 0.6931472, %v300_v25  ;;  %v225_v59 = vmul.f32 %v504_v39, %v185_v30 }
  0x51   :  { %v171_v45 = vsel %vm552_vm6, %v168_v46, %v165_v4  ;;  %v186_v9 = vadd.f32 %v162_v8, %v461_v60  ;;  %v232_v28 = vadd.f32 %v224_v36, %v478_v11  ;;  %v204_v60 = vmul.f32 %v196_v63, %v431_v7 }
  0x52   :  { %v187_v35 = vadd.f32 %v171_v45, %v463_v61  ;;  %v239_v29 = vadd.f32 %v238_v16, %v231_v58  ;;  %v180_v19 = vsel %vm179_vm7, %v177_v21, %v174_v26  ;;  %v233_v24 = vadd.f32 %v225_v59, %v481_v13 }
  0x53   :  { %v226_v32 = vmul.f32 %v510_v44, %v186_v9  ;;  %v188_v33 = vadd.f32 %v180_v19, %v465_v62 }
  0x54   :  { %v227_v37 = vmul.f32 %v219_v34, %v187_v35  ;;  %v240_v39 = vadd.f32 %v239_v29, %v232_v28 }
  0x55   :  { %v234_v61 = vadd.f32 %v226_v32, %v484_v14  ;;  %v228_v38 = vmul.f32 %v220_v10, %v188_v33 }
  0x56   :  { %v235_v5 = vadd.f32 %v227_v37, %v487_v0  ;;  %v241_v11 = vadd.f32 %v240_v39, %v233_v24 }
  0x57   :  { %v236_v42 = vadd.f32 %v228_v38, %v204_v60 }
  0x58   :  { %v242_v43 = vadd.f32 %v241_v11, %v234_v61 }
  0x5a   :  { %v243_v48 = vadd.f32 %v242_v43, %v235_v5 }
  0x5c   :  { %v244_v13 = vadd.f32 %v243_v48, %v236_v42 }
  0x5e   :  { %246 = vst [vmem:[#allocation7] sm:$0xff] %v244_v13 }
  0x5f   :  { %356 = shalt.err (!%p353_p6)
}
  0x60   :  { %s357_s10 = scalar_lea.hbm %s600_s2, 128 }
  0x61   :  { %p358_p7 = scmp.ne.s32.totalorder %s600_s2, %s357_s10  ;;  %p361_p8 = scmp.lt.u32.totalorder %s357_s10, %s600_s2 }
  0x63   :  { %p363_p9 = pnand %p361_p8, %p358_p7 }
  0x65   :  { %366 = shalt.err (!%p363_p9)
}
  0x66   :  { %256 = dma.vmem_to_hbm [thread:$0]  %s254_s6, 128, %s600_s2, [#allocation4]  }
  0x67   :  { %371 = dma.done.wait [#allocation4], 128  }
  0x68   :  { %372 = vsyncadd [#allocation4], 4294967168 }
  0x69   :  { %260 = vsyncpa [#allocation3], 1 }
  0x6a   :  { %261 = vsyncpa [#allocation6], 1 }
  0x6b   :  { %262 = vsyncpa [#allocation4], 1 }

</bundles_post_ra>
